<compile_context>
chip_gen: v6e
topology: v6e:2x2x1
jax: 0.10.0
libtpu: 0.0.40
codegen_flags: <defaults>
</compile_context>

<pallas_src>
import numpy as np
import jax
import jax.numpy as jnp
from jax.experimental import pallas as pl
from jax.experimental.pallas import tpu as pltpu


def _ltp_kernel(x1t_ref, x2t_ref, r1t_ref, r2t_ref, cwt_ref, ot_ref):
    """Fused TensorProduct + Linear for one Z tile (Z on the lane axis).

    x1t_ref: [n1, TZ]       bf16   (n1 = mul_mid*dim1)
    x2t_ref: [n2, TZ]       bf16   (n2 = mul_mid*dim2)
    r1t_ref: [P, n1]        bf16   0/1 row-expansion (each (m,i) row repeated dim2x)
    r2t_ref: [P, n2]        bf16   0/1 row-expansion (each (m,:) block tiled dim1x)
    cwt_ref: [dim_out, P]   bf16   fused (mixing_matrix x Linear weight), transposed
    ot_ref : [dim_out, TZ]  output dtype
    with P = mul_mid*dim1*dim2 and row order p = m*dim1*dim2 + i*dim2 + j.
    """
    x1e = jnp.dot(r1t_ref[...], x1t_ref[...],
                  preferred_element_type=jnp.float32)           # [P, TZ]
    x2e = jnp.dot(r2t_ref[...], x2t_ref[...],
                  preferred_element_type=jnp.float32)           # [P, TZ]
    outer = (x1e * x2e).astype(jnp.bfloat16)                    # [P, TZ]  (VPU)
    acc = jnp.dot(cwt_ref[...], outer,
                  preferred_element_type=jnp.float32)           # [dim_out, TZ]
    ot_ref[...] = acc.astype(ot_ref.dtype)


def _round_up(a, b):
    return ((a + b - 1) // b) * b


def learnable_tensor_product(x1, x2, mixing_matrix, weight, mul_mid, *, tz=4096):
    """x1, x2: [..., mul_mid*dim_in]; returns [..., dim_out]."""
    *size, n1 = x1.shape
    *size2, n2 = x2.shape
    assert size == size2
    dim_k, dim1, dim2 = mixing_matrix.shape
    assert n1 == mul_mid * dim1 and n2 == mul_mid * dim2
    dim_out = weight.shape[1]
    assert weight.shape[0] == mul_mid * dim_k
    P = mul_mid * dim1 * dim2

    z = int(np.prod(size)) if size else 1
    # Channels-first (Z on the lane axis) + bf16 operands: one fused XLA
    # transpose/convert pass in the wrapper (layout plumbing, not compute).
    x1t = x1.reshape(z, n1).T.astype(jnp.bfloat16)    # [n1, z]
    x2t = x2.reshape(z, n2).T.astype(jnp.bfloat16)    # [n2, z]

    # ---- parameter prep (once per call) -------------------------------------
    # Fuse the Linear into the tensor product, already transposed:
    #   CW^T[o, m*dim1*dim2 + i*dim2 + j] = sum_k C[k,i,j] * W[m*dim_k + k, o]
    c_mat = jnp.transpose(mixing_matrix, (1, 2, 0)).reshape(dim1 * dim2, dim_k)
    w3 = weight.reshape(mul_mid, dim_k, dim_out)
    cwt = jnp.einsum('pk,mko->omp', c_mat, w3).reshape(dim_out, P)
    cwt = cwt.astype(jnp.bfloat16)

    # Exact 0/1 row-expansion (selection) matrices, transposed: [P, n].
    r1t_np = np.zeros((P, mul_mid * dim1), np.float32)
    r2t_np = np.zeros((P, mul_mid * dim2), np.float32)
    for m in range(mul_mid):
        for i in range(dim1):
            for j in range(dim2):
                p = m * dim1 * dim2 + i * dim2 + j
                r1t_np[p, m * dim1 + i] = 1.0
                r2t_np[p, m * dim2 + j] = 1.0
    r1t = jnp.asarray(r1t_np, dtype=jnp.bfloat16)
    r2t = jnp.asarray(r2t_np, dtype=jnp.bfloat16)

    # ---- tiling: Z tile is a multiple of 128 lanes ---------------------------
    # Cap the tile so the grid has >= 2 steps whenever possible (both TCs busy).
    tz_eff = max(128, _round_up(min(tz, pl.cdiv(z, 2)), 128))
    zp = z
    if z < tz_eff:                      # only possible when z < 128: tiny pad
        zp = tz_eff
        x1t = jnp.pad(x1t, ((0, 0), (0, zp - z)))
        x2t = jnp.pad(x2t, ((0, 0), (0, zp - z)))
    grid = pl.cdiv(zp, tz_eff)          # ragged last block: Pallas masks writes

    out_t = pl.pallas_call(
        _ltp_kernel,
        out_shape=jax.ShapeDtypeStruct((dim_out, zp), x1.dtype),
        grid_spec=pltpu.PrefetchScalarGridSpec(
            num_scalar_prefetch=0,
            grid=(grid,),
            in_specs=[
                pl.BlockSpec((n1, tz_eff), lambda i: (0, i)),
                pl.BlockSpec((n2, tz_eff), lambda i: (0, i)),
                # constants: same block every step -> stay resident in VMEM
                pl.BlockSpec((P, n1), lambda i: (0, 0)),
                pl.BlockSpec((P, n2), lambda i: (0, 0)),
                pl.BlockSpec((dim_out, P), lambda i: (0, 0)),
            ],
            out_specs=pl.BlockSpec((dim_out, tz_eff), lambda i: (0, i)),
        ),
        compiler_params=pltpu.CompilerParams(
            dimension_semantics=("parallel",)),
    )(x1t, x2t, r1t, r2t, cwt)

    return out_t[:, :z].T.reshape(*size, dim_out)


def _reference(x1, x2, mixing_matrix, weight, mul_mid):
    *size, n1 = x1.shape
    dim_k, dim1, dim2 = mixing_matrix.shape
    z = int(np.prod(size)) if size else 1
    a = x1.reshape(z, mul_mid, dim1)
    b = x2.reshape(z, mul_mid, dim2)
    tp = jnp.einsum('kij,zmi,zmj->zmk', mixing_matrix, a, b,
                    precision=jax.lax.Precision.HIGHEST)
    y = jnp.dot(tp.reshape(z, mul_mid * dim_k), weight,
                precision=jax.lax.Precision.HIGHEST)
    return y.reshape(*size, weight.shape[1])


if __name__ == "__main__":
    # Rs_mid_1 = Rs_mid_2 = [(1, 0), (1, 1)] -> dim_in = 1 + 3 = 4
    # tensor-product output irreps: (0x0->0)+(0x1->1)+(1x0->1)+(1x1->0,1,2)
    #   -> dim_k = 1 + 3 + 3 + 9 = 16
    # mul_mid = 4, final Rs_out = [(2, 0), (2, 1)] -> dim_out = 2 + 6 = 8
    mul_mid, dim1, dim2, dim_k, dim_out = 4, 4, 4, 16, 8
    batch = (2, 8)

    key = jax.random.PRNGKey(0)
    k1, k2, k3, k4 = jax.random.split(key, 4)
    x1 = jax.random.normal(k1, (*batch, mul_mid * dim1), dtype=jnp.float32)
    x2 = jax.random.normal(k2, (*batch, mul_mid * dim2), dtype=jnp.float32)
    # deterministic synthetic parameters (correct shapes)
    mixing_matrix = jax.random.normal(k3, (dim_k, dim1, dim2), dtype=jnp.float32) * 0.5
    weight = jax.random.normal(k4, (mul_mid * dim_k, dim_out), dtype=jnp.float32) * 0.1

    y = learnable_tensor_product(x1, x2, mixing_matrix, weight, mul_mid)
    y = jax.block_until_ready(y)

    y_ref = _reference(x1, x2, mixing_matrix, weight, mul_mid)
    assert y.shape == (*batch, dim_out), y.shape
    assert y.dtype == x1.dtype, y.dtype
    # bf16-operand / f32-accumulate MXU path -> compare at bf16-level tolerance.
    np.testing.assert_allclose(np.asarray(y), np.asarray(y_ref), rtol=2e-2, atol=5e-2)

    print("KERNEL_OK")
</pallas_src>

<mosaic_0001>
module attributes {stable_mosaic.version = 11 : i64} {
  func.func @_ltp_kernel(%arg0: i32, %arg1: memref<16x128xbf16, #tpu.memory_space<vmem>>, %arg2: memref<16x128xbf16, #tpu.memory_space<vmem>>, %arg3: memref<64x16xbf16, #tpu.memory_space<vmem>>, %arg4: memref<64x16xbf16, #tpu.memory_space<vmem>>, %arg5: memref<8x64xbf16, #tpu.memory_space<vmem>>, %arg6: memref<8x128xf32, #tpu.memory_space<vmem>>) attributes {dimension_semantics = [#tpu.dimension_semantics<parallel>], iteration_bounds = array<i64: 1>, scalar_prefetch = 0 : i64, scratch_operands = 0 : i64, tpu.core_type = #tpu.core_type<tc>, window_params = [{transform_indices = @transform_0, window_bounds = array<i64: 16, 128>}, {transform_indices = @transform_1, window_bounds = array<i64: 16, 128>}, {pipeline_mode = #tpu.pipeline_mode<synchronous>, transform_indices = @transform_2, window_bounds = array<i64: 64, 16>}, {pipeline_mode = #tpu.pipeline_mode<synchronous>, transform_indices = @transform_3, window_bounds = array<i64: 64, 16>}, {pipeline_mode = #tpu.pipeline_mode<synchronous>, transform_indices = @transform_4, window_bounds = array<i64: 8, 64>}, {transform_indices = @transform_5, window_bounds = array<i64: 8, 128>}]} {
    %c0 = arith.constant 0 : index
    %c0_0 = arith.constant 0 : index
    %0 = vector.load %arg3[%c0, %c0_0] : memref<64x16xbf16, #tpu.memory_space<vmem>>, vector<64x16xbf16>
    %c0_1 = arith.constant 0 : index
    %c0_2 = arith.constant 0 : index
    %1 = vector.load %arg1[%c0_1, %c0_2] : memref<16x128xbf16, #tpu.memory_space<vmem>>, vector<16x128xbf16>
    %cst = arith.constant dense<0.000000e+00> : vector<64x128xf32>
    %2 = tpu.matmul %0, %1, %cst {dimension_numbers = #tpu.dot_dimension_numbers<[1], [0], [0], [1], [0, 0, 1, 1], [], []>} : vector<64x16xbf16>, vector<16x128xbf16>, vector<64x128xf32> -> vector<64x128xf32>
    %c0_3 = arith.constant 0 : index
    %c0_4 = arith.constant 0 : index
    %3 = vector.load %arg4[%c0_3, %c0_4] : memref<64x16xbf16, #tpu.memory_space<vmem>>, vector<64x16xbf16>
    %c0_5 = arith.constant 0 : index
    %c0_6 = arith.constant 0 : index
    %4 = vector.load %arg2[%c0_5, %c0_6] : memref<16x128xbf16, #tpu.memory_space<vmem>>, vector<16x128xbf16>
    %cst_7 = arith.constant dense<0.000000e+00> : vector<64x128xf32>
    %5 = tpu.matmul %3, %4, %cst_7 {dimension_numbers = #tpu.dot_dimension_numbers<[1], [0], [0], [1], [0, 0, 1, 1], [], []>} : vector<64x16xbf16>, vector<16x128xbf16>, vector<64x128xf32> -> vector<64x128xf32>
    %6 = arith.mulf %2, %5 : vector<64x128xf32>
    %7 = arith.truncf %6 : vector<64x128xf32> to vector<64x128xbf16>
    %c0_8 = arith.constant 0 : index
    %c0_9 = arith.constant 0 : index
    %8 = vector.load %arg5[%c0_8, %c0_9] : memref<8x64xbf16, #tpu.memory_space<vmem>>, vector<8x64xbf16>
    %cst_10 = arith.constant dense<0.000000e+00> : vector<8x128xf32>
    %9 = tpu.matmul %8, %7, %cst_10 {dimension_numbers = #tpu.dot_dimension_numbers<[1], [0], [0], [1], [0, 0, 1, 1], [], []>} : vector<8x64xbf16>, vector<64x128xbf16>, vector<8x128xf32> -> vector<8x128xf32>
    %c0_11 = arith.constant 0 : index
    %c0_12 = arith.constant 0 : index
    %10 = vector.load %arg6[%c0_11, %c0_12] : memref<8x128xf32, #tpu.memory_space<vmem>>, vector<8x128xf32>
    tpu.vector_store %arg6[%c0_11, %c0_12], %9 {strides = array<i32>} : memref<8x128xf32, #tpu.memory_space<vmem>>, vector<8x128xf32>,
    return
  }
  func.func @transform_0(%arg0: i32) -> (i32, i32) {
    %c0_i32 = arith.constant 0 : i32
    %c0_i32_0 = arith.constant 0 : i32
    return %c0_i32, %arg0 : i32, i32
  }
  func.func @transform_1(%arg0: i32) -> (i32, i32) {
    %c0_i32 = arith.constant 0 : i32
    %c0_i32_0 = arith.constant 0 : i32
    return %c0_i32, %arg0 : i32, i32
  }
  func.func @transform_2(%arg0: i32) -> (i32, i32) {
    %c0_i32 = arith.constant 0 : i32
    %c0_i32_0 = arith.constant 0 : i32
    %c0_i32_1 = arith.constant 0 : i32
    return %c0_i32, %c0_i32_0 : i32, i32
  }
  func.func @transform_3(%arg0: i32) -> (i32, i32) {
    %c0_i32 = arith.constant 0 : i32
    %c0_i32_0 = arith.constant 0 : i32
    %c0_i32_1 = arith.constant 0 : i32
    return %c0_i32, %c0_i32_0 : i32, i32
  }
  func.func @transform_4(%arg0: i32) -> (i32, i32) {
    %c0_i32 = arith.constant 0 : i32
    %c0_i32_0 = arith.constant 0 : i32
    %c0_i32_1 = arith.constant 0 : i32
    return %c0_i32, %c0_i32_0 : i32, i32
  }
  func.func @transform_5(%arg0: i32) -> (i32, i32) {
    %c0_i32 = arith.constant 0 : i32
    %c0_i32_0 = arith.constant 0 : i32
    return %c0_i32, %arg0 : i32, i32
  }
}

</mosaic_0001>

<bundles_post_ra>
// kernel: tpu_custom_call.1
= control target key start
LH: loop header
LB: loop body
LE: loop exit
PB: predicated region body
PF: predicated region fallthrough
CT: control target
= control target key end

     0   :  { %vm58_vm0 = vcmask 130048   ;;  %s499_s0 = inlined_call_operand.vmem [shape: bf16[16,128], index: 0, kind: input, shape index: {}]   ;;  %s500_s1 = inlined_call_operand.vmem [shape: bf16[16,128], index: 1, kind: input, shape index: {}]   ;;  %s501_s2 = inlined_call_operand.vmem [shape: bf16[64,16], index: 2, kind: input, shape index: {}]   ;;  %s502_s3 = inlined_call_operand.vmem [shape: bf16[64,16], index: 3, kind: input, shape index: {}]   ;;  %s503_s4 = inlined_call_operand.vmem [shape: bf16[8,64], index: 4, kind: input, shape index: {}]   ;;  %s504_s5 = inlined_call_operand.hbm [shape: f32[8,128], index: 5, kind: output, shape index: {}]  }
   0x1   :  { %v390_v0 = vld [vmem:[%s499_s0] sm:$0xff]   ;;  %v394_v4 = vld [vmem:[%s501_s2 + $0x8] sm:$0xff]   ;;  %v396_v6 = vld [vmem:[%s501_s2 + $0x10] sm:$0xff]  }
   0x2   :  { %v391_v1 = vld [vmem:[%s500_s1] sm:$0xff]   ;;  %355 = vmatprep.subr.bf16.mxu0 %v390_v0  ;;  %v395_v5 = vld [vmem:[%s502_s3 + $0x8] sm:$0xff]   ;;  %v397_v7 = vld [vmem:[%s502_s3 + $0x10] sm:$0xff]  }
   0x3   :  { %v392_v2 = vld [vmem:[%s501_s2] sm:$0xff]   ;;  %365 = vmatprep.subr.bf16.mxu1 %v391_v1  ;;  %356 = vmatpush3.bf16.msra.mxu0 %v390_v0  ;;  %v398_v8 = vld [vmem:[%s501_s2 + $0x18] sm:$0xff]  }
   0x4   :  { %v393_v3 = vld [vmem:[%s502_s3] sm:$0xff]   ;;  %366 = vmatpush3.bf16.msra.mxu1 %v391_v1  ;;  %357 = vmatprep.mubr.msk.bf16.mxu0 %vm58_vm0, %v392_v2 }
   0x5   :  { %367 = vmatprep.mubr.msk.bf16.mxu1 %vm58_vm0, %v393_v3 }
   0x6   :  { %358 = vmatmul.mubr.msk.bf16.vlgmr.msra.gmra.mxu0 %vm58_vm0, %v394_v4 }
   0x7   :  { %368 = vmatmul.mubr.msk.bf16.vlgmr.msra.gmra.mxu1 %vm58_vm0, %v395_v5  ;;  %361 = vmatprep.mubr.msk.bf16.mxu0 %vm58_vm0, %v396_v6 }
   0x8   :  { %371 = vmatprep.mubr.msk.bf16.mxu1 %vm58_vm0, %v397_v7 }
   0x9   :  { %10 = vsyncpa [#allocation3], 0  ;;  %v399_v9 = vld [vmem:[%s502_s3 + $0x18] sm:$0xff]   ;;  %v422_v10 = vmov 0.0   ;;  %vm423_vm1 = vmmov 0   ;;  %vm262_vm2 = vcmask 523264  }
   0xa   :  { %375 = vmatprep.subr.bf16.mxu0 %v422_v10  ;;  %v261_v39 = vld [vmem:[%s503_s4] sm:$0xf]  ;;  %s424_s11 = smov [#allocation2]  }
   0xb   :  { %s313_s12 = sshll.u32 %s424_s11, 4  ;;  %s314_s12 = int_to_ptr.vmem [resolvable:$true] %s313_s12 }
   0xc   :  { %s400_s13 = scalar_lea.vmem %s314_s12, 128  ;;  %p405_p1 = scmp.lt.s32.totalorder %s314_s12, %s314_s12 }
   0xd   :  { %p401_p0 = scmp.ne.s32.totalorder %s314_s12, %s400_s13  ;;  %p406_p2 = scmp.lt.s32.totalorder %s400_s13, %s400_s13 }
   0xe   :  { %362 = vmatmul.mubr.msk.bf16.gmra.mxu0 %vm58_vm0, %v398_v8 }
   0xf   :  { %372 = vmatmul.mubr.msk.bf16.gmra.mxu1 %vm58_vm0, %v399_v9  ;;  %383 = vmatprep.mubr.msk.bf16.mxu0 %vm423_vm1, %v422_v10  ;;  %p407_p3 = por %p406_p2, %p405_p1 }
  0x11   :  { %p408_p4 = pnand %p407_p3, %p401_p0 }
  0xc6   :  { %v359_v11 = vpop.f32.mrf.mxu0 }
  0xc7   :  { %v369_v12 = vpop.f32.mrf.mxu1 }
  0xc8   :  { %v105_v13 = vpop.f32.mrf.mxu0  ;;  %v251_v34 = vmul.f32 %v369_v12, %v359_v11 }
  0xc9   :  { %v218_v14 = vpop.f32.mrf.mxu1 }
  0xca   :  { %v360_v15 = vpop.f32.mrf.mxu0  ;;  %v249_v37 = vmul.f32 %v218_v14, %v105_v13 }
  0xcb   :  { %v370_v16 = vpop.f32.mrf.mxu1 }
  0xcc   :  { %v108_v17 = vpop.f32.mrf.mxu0  ;;  %v252_v32 = vmul.f32 %v370_v16, %v360_v15 }
  0xcd   :  { %v221_v18 = vpop.f32.mrf.mxu1 }
  0xce   :  { %v363_v19 = vpop.f32.mrf.mxu0  ;;  %v258_v35 = vpack.c.bf16 %v252_v32, %v251_v34  ;;  %v250_v36 = vmul.f32 %v221_v18, %v108_v17 }
  0xcf   :  { %v373_v20 = vpop.f32.mrf.mxu1 }
  0xd0   :  { %v121_v21 = vpop.f32.mrf.mxu0  ;;  %v255_v25 = vmul.f32 %v373_v20, %v363_v19  ;;  %v257_v38 = vpack.c.bf16 %v250_v36, %v249_v37 }
  0xd1   :  { %v234_v22 = vpop.f32.mrf.mxu1 }
  0xd2   :  { %v364_v23 = vpop.f32.mrf.mxu0  ;;  %v253_v31 = vmul.f32 %v234_v22, %v121_v21 }
  0xd3   :  { %v374_v24 = vpop.f32.mrf.mxu1 }
  0xd4   :  { %v256_v26 = vmul.f32 %v374_v24, %v364_v23  ;;  %v124_v27 = vpop.f32.mrf.mxu0 }
  0xd5   :  { %v237_v28 = vpop.f32.mrf.mxu1 }
  0xd6   :  { %v260_v29 = vpack.c.bf16 %v256_v26, %v255_v25  ;;  %v254_v30 = vmul.f32 %v237_v28, %v124_v27 }
  0xd8   :  { %376 = vmatpush3.bf16.msra.mxu0 %v260_v29  ;;  %v259_v33 = vpack.c.bf16 %v254_v30, %v253_v31 }
  0xd9   :  { %377 = vmatprep.subr.bf16.mxu0 %v422_v10 }
  0xdc   :  { %378 = vmatpush3.bf16.msra.mxu0 %v259_v33 }
  0xdd   :  { %379 = vmatprep.subr.bf16.mxu0 %v422_v10 }
  0xe0   :  { %380 = vmatpush3.bf16.msra.mxu0 %v258_v35 }
  0xe1   :  { %381 = vmatprep.subr.bf16.mxu0 %v422_v10 }
  0xe4   :  { %382 = vmatpush3.bf16.msra.mxu0 %v257_v38 }
  0xe7   :  { %384 = vmatmul.mubr.msk.bf16.vlgmr.msra.gmra.mxu0 %vm262_vm2, %v261_v39 }
 0x1a7   :  { %v300_v40 = vpop.f32.mrf.mxu0 }
 0x1a8   :  { %306 = vst [vmem:[#allocation2] sm:$0xff] %v300_v40 }
 0x1a9   :  { %v385_v41 = vpop.f32.mrf.mxu0 }
 0x1aa   :  { %411 = shalt.err (!%p408_p4)
}
 0x1ab   :  { %316 = dma.vmem_to_hbm [thread:$0]  %s314_s12, 128, %s504_s5, [#allocation3]   ;;  %v303_v42 = vpop.f32.mrf.mxu0 }
 0x1ad   :  { %v386_v43 = vpop.f32.mrf.mxu0 }
 0x1ae   :  { %420 = dma.done.wait [#allocation3], 128  }
 0x1af   :  { %421 = vsyncadd [#allocation3], 4294967168 }
 0x1b0   :  { %320 = vsyncpa [#allocation3], 1 }

</bundles_post_ra>
